<compile_context>
chip_gen: v7x
topology: tpu7x:2x2x1
jax: 0.10.0
libtpu: 0.0.40
codegen_flags: <defaults>
</compile_context>

<pallas_src>
import functools

import jax
import jax.numpy as jnp
from jax.experimental import pallas as pl
from jax.experimental.pallas import tpu as pltpu


def _round_up(x, m):
    return ((x + m - 1) // m) * m


# ----------------------------------------------------------------------------
# Plain-JAX glue: SSD box matching / encoding (box_utils.match equivalent)
# (argmax / scatter over a small (num_obj, P) overlap matrix: no clean Pallas
#  form; kept in XLA and vmapped over the batch.)
# TODO(synk): mask padded/dummy GT rows (zero-area boxes) before matching if
#             the dataloader pads `targets` to a fixed num_obj.
# ----------------------------------------------------------------------------
def _point_form(priors):
    return jnp.concatenate(
        [priors[:, :2] - priors[:, 2:] / 2.0,
         priors[:, :2] + priors[:, 2:] / 2.0], axis=1)


def _jaccard(box_a, box_b):
    max_xy = jnp.minimum(box_a[:, None, 2:], box_b[None, :, 2:])
    min_xy = jnp.maximum(box_a[:, None, :2], box_b[None, :, :2])
    wh = jnp.clip(max_xy - min_xy, 0.0, None)
    inter = wh[..., 0] * wh[..., 1]
    area_a = ((box_a[:, 2] - box_a[:, 0]) * (box_a[:, 3] - box_a[:, 1]))[:, None]
    area_b = ((box_b[:, 2] - box_b[:, 0]) * (box_b[:, 3] - box_b[:, 1]))[None, :]
    return inter / (area_a + area_b - inter)


def _encode(matched, priors, variances):
    g_cxcy = (matched[:, :2] + matched[:, 2:]) / 2.0 - priors[:, :2]
    g_cxcy = g_cxcy / (variances[0] * priors[:, 2:])
    g_wh = (matched[:, 2:] - matched[:, :2]) / priors[:, 2:]
    g_wh = jnp.log(g_wh) / variances[1]
    return jnp.concatenate([g_cxcy, g_wh], axis=1)


def _match_one(threshold, truths, priors, variances, labels):
    overlaps = _jaccard(truths, _point_form(priors))          # (num_obj, P)
    best_prior_idx = jnp.argmax(overlaps, axis=1)              # (num_obj,)
    best_truth_overlap = jnp.max(overlaps, axis=0)             # (P,)
    best_truth_idx = jnp.argmax(overlaps, axis=0)              # (P,)
    best_truth_overlap = best_truth_overlap.at[best_prior_idx].set(2.0)
    for j in range(truths.shape[0]):                           # small static loop
        best_truth_idx = best_truth_idx.at[best_prior_idx[j]].set(j)
    matches = truths[best_truth_idx]                           # (P, 4)
    conf = labels[best_truth_idx].astype(jnp.int32) + 1        # (P,)
    conf = jnp.where(best_truth_overlap < threshold, 0, conf)
    loc = _encode(matches, priors, variances)
    return loc, conf


# ----------------------------------------------------------------------------
# Tile sizing from a VMEM budget (double-buffered block footprint).
# ----------------------------------------------------------------------------
def _choose_prior_tile(P, C, distill, budget_bytes=16 * 1024 * 1024):
    P128 = _round_up(P, 128)
    # columns of 4-byte data per prior that live in VMEM per block set
    # (loc/loc_t[/locT] + conf[/confT] + conf_t + ce[/kl] outputs), worst-case f32.
    k_cols = (4 + C) * (2 if distill else 1) + 4 + 1 + (2 if distill else 1)

    def per_step(tp):                       # x2 for BlockSpec double buffering
        return 2 * (tp * k_cols * 4 + 8 * 128 * 4)

    if per_step(P128) <= budget_bytes:
        return P128                          # one tile per batch element
    n = P128 // 128
    for d in sorted((d for d in range(1, n + 1) if n % d == 0), reverse=True):
        if per_step(128 * d) <= budget_bytes:
            return 128 * d                   # exact divisor -> no pad waste
    return 128


# ----------------------------------------------------------------------------
# Pallas kernel: one (batch, prior-tile) step over lane-dense (K, TP) blocks.
#   Emits
#     * ce_ref  : per-prior  lse_row - gt_logit            (1, 1, TP)
#     * kl_ref  : per-prior  weighted-KL soft loss         (1, 1, TP) [distill]
#     * stats   : per-(batch,tile) scalar partial sums     (1, 8, 128)
#                 sublanes: 0 loss_l(smoothL1), 1 sse_s, 2 sse_t, 3 hint_sse
# ----------------------------------------------------------------------------
def _multibox_kernel(*refs, distill, neg_w, pos_w, T):
    if distill:
        (loc_ref, conf_ref, locT_ref, confT_ref, loct_ref, conft_ref,
         ce_ref, kl_ref, stats_ref) = refs
    else:
        (loc_ref, conf_ref, loct_ref, conft_ref, ce_ref, stats_ref) = refs

    conf = conf_ref[0].astype(jnp.float32)    # (C, TP) class on sublanes
    loc = loc_ref[0].astype(jnp.float32)      # (4, TP)
    loc_t = loct_ref[0]                       # (4, TP) f32
    conf_t = conft_ref[0]                     # (1, TP) int32
    C, TP = conf.shape

    pos = conf_t > 0
    posf = pos.astype(jnp.float32)                         # (1, TP)

    # ---- localization: smooth-L1 over positives (reuse d*d for sse_s) ----
    d = loc - loc_t
    ad = jnp.abs(d)
    d2 = d * d
    sl1 = jnp.where(ad < 1.0, 0.5 * d2, ad - 0.5)
    loss_l = jnp.sum(sl1 * posf)
    sse_s = jnp.sum(d2 * posf)

    # ---- one shared row log-sum-exp over the class (sublane) axis ----
    # (identical value to the original's global-max log_sum_exp)
    row_max = jnp.max(conf, axis=0, keepdims=True)         # (1, TP)
    e = jnp.exp(conf - row_max)                            # (C, TP)
    sum_e = jnp.sum(e, axis=0, keepdims=True)              # (1, TP)
    lse = jnp.log(sum_e) + row_max                         # (1, TP)

    cls_iota = jax.lax.broadcasted_iota(jnp.int32, (C, TP), 0)
    onehot = (cls_iota == conf_t).astype(jnp.float32)
    x_gt = jnp.sum(conf * onehot, axis=0, keepdims=True)   # (1, TP)

    ce_ref[0] = lse - x_gt                                 # per-prior CE / mining loss

    sse_t = jnp.float32(0.0)
    hint_sse = jnp.float32(0.0)
    if distill:
        confT = confT_ref[0].astype(jnp.float32)           # (C, TP)
        locT = locT_ref[0].astype(jnp.float32)             # (4, TP)

        # student log-softmax at temperature T: log-softmax identity removes
        # the log(softmax + eps) pass and the reciprocal (EUP relief on v7x).
        if T == 1.0:
            log_ps = conf - lse                            # reuse shared LSE
        else:
            zs = conf * (1.0 / T)
            zs = zs - jnp.max(zs, axis=0, keepdims=True)
            log_ps = zs - jnp.log(jnp.sum(jnp.exp(zs), axis=0, keepdims=True))

        # teacher softmax (feeds a multiply only -> approx reciprocal is fine)
        zt = confT * (1.0 / T)
        zt = zt - jnp.max(zt, axis=0, keepdims=True)
        et = jnp.exp(zt)
        qt = et * pl.reciprocal(jnp.sum(et, axis=0, keepdims=True), approx=True)

        eps = 1e-10
        w = jnp.where(cls_iota == 0, jnp.float32(neg_w), jnp.float32(pos_w))
        kl_ref[0] = -jnp.sum((w * (qt + eps)) * log_ps,
                             axis=0, keepdims=True)        # (1, TP)

        dT = locT - loc_t
        sse_t = jnp.sum(dT * dT * posf)
        dc = conf - confT
        hint_sse = jnp.sum(dc * dc)

    # ---- per-(batch, tile) scalar partials: plain store, no RMW / no init ----
    # (keeps both grid axes "parallel"; tiny partials are summed in XLA glue)
    r = jax.lax.broadcasted_iota(jnp.int32, (1, 8, 128), 1)
    stats_ref[...] = (jnp.where(r == 0, loss_l, 0.0)
                      + jnp.where(r == 1, sse_s, 0.0)
                      + jnp.where(r == 2, sse_t, 0.0)
                      + jnp.where(r == 3, hint_sse, 0.0))


# ----------------------------------------------------------------------------
# Wrapper = MultiBoxLoss.forward
# ----------------------------------------------------------------------------
def multibox_loss_forward(predictions, predT, targets, *, num_classes,
                          overlap_thresh=0.5, negpos_ratio=3, neg_w=1.5,
                          pos_w=1.0, T=1.0, reg_m=0.0, lmda=1.0, u=1.0,
                          channel_major=False,
                          vmem_budget_bytes=16 * 1024 * 1024):
    loc_data, conf_data, priors = predictions
    distill = predT is not None

    if channel_major:
        # model head already emits (B, 4, P) / (B, C, P): no transpose pre-pass
        B, _, P = loc_data.shape
        C = conf_data.shape[1]
    else:
        B, P, _ = loc_data.shape
        C = conf_data.shape[2]
    assert C == num_classes
    priors = priors[:P, :].astype(jnp.float32)
    variances = (0.1, 0.2)

    # ---- ground-truth matching (vmapped XLA glue) ----
    targets = jnp.asarray(targets)
    truths_b = targets[..., :4].astype(jnp.float32)
    labels_b = targets[..., 4]
    loc_t, conf_t = jax.vmap(
        lambda t, l: _match_one(overlap_thresh, t, priors, variances, l)
    )(truths_b, labels_b)                                 # (B,P,4) f32, (B,P) i32

    # ---- lane-dense (B, K, P_pad) layout; TP derived from VMEM budget ----
    TP = _choose_prior_tile(P, C, distill, vmem_budget_bytes)
    P_pad = _round_up(P, TP)
    pad = P_pad - P
    num_tiles = P_pad // TP

    def _pad_p(x):
        return jnp.pad(x, ((0, 0), (0, 0), (0, pad))) if pad else x

    def to_kp(x, already_kp):
        # NOTE: dtype is preserved (bf16 heads keep bf16 through HBM; the
        # kernel casts to f32 after the load).
        # TODO(synk): for layouts that still need it, the (B,P,C)->(B,C,P)
        # transpose is a full extra HBM round-trip of the largest tensors;
        # prefer channel_major=True (emit (B,C,P) upstream).
        x = jnp.asarray(x)
        if not already_kp:
            x = jnp.transpose(x, (0, 2, 1))
        return _pad_p(x)

    loc_k = to_kp(loc_data, channel_major)
    conf_k = to_kp(conf_data, channel_major)
    loct_k = to_kp(loc_t, False)
    conft_k = _pad_p(conf_t.astype(jnp.int32)[:, None, :])   # pad label 0 => not positive

    inputs = [loc_k, conf_k]
    if distill:
        locT, confT = predT
        inputs += [to_kp(locT, channel_major), to_kp(confT, channel_major)]
    inputs += [loct_k, conft_k]

    grid = (B, num_tiles)

    def io_map(b, pj):
        return (b, 0, pj)

    def stat_map(b, pj):
        return (b * num_tiles + pj, 0, 0)

    def spec(k):
        return pl.BlockSpec((1, k, TP), io_map)

    in_specs = [spec(4), spec(C)]
    if distill:
        in_specs += [spec(4), spec(C)]
    in_specs += [spec(4), spec(1)]

    out_shape = [jax.ShapeDtypeStruct((B, 1, P_pad), jnp.float32)]     # ce per prior
    out_specs = [spec(1)]
    if distill:
        out_shape += [jax.ShapeDtypeStruct((B, 1, P_pad), jnp.float32)]  # kl per prior
        out_specs += [spec(1)]
    out_shape += [jax.ShapeDtypeStruct((B * num_tiles, 8, 128), jnp.float32)]  # partials
    out_specs += [pl.BlockSpec((1, 8, 128), stat_map)]
    out_shape = tuple(out_shape)
    out_specs = tuple(out_specs)

    kernel = functools.partial(_multibox_kernel, distill=distill,
                               neg_w=float(neg_w), pos_w=float(pos_w), T=float(T))

    n_elem = B * C * P_pad
    bytes_in = sum(int(x.size) * x.dtype.itemsize for x in inputs)
    bytes_out = B * P_pad * 4 * (2 if distill else 1) + B * num_tiles * 8 * 128 * 4
    cost = pl.CostEstimate(
        flops=int((28 if distill else 14) * n_elem + 30 * B * 4 * P_pad),
        transcendentals=int((2 if distill else 1) * n_elem + 3 * B * P_pad),
        bytes_accessed=int(bytes_in + bytes_out))

    results = pl.pallas_call(
        kernel,
        out_shape=out_shape,
        grid_spec=pltpu.PrefetchScalarGridSpec(
            num_scalar_prefetch=0, grid=grid,
            in_specs=in_specs, out_specs=out_specs),
        compiler_params=pltpu.CompilerParams(
            # both axes fully parallel (per-tile stats, no resident block)
            dimension_semantics=("parallel", "parallel"),
            # TP chosen under a 16 MiB double-buffered budget -> 32 MiB scoped
            # limit holds on v5e/v6e (128 MiB) and v7x (64 MiB physical).
            vmem_limit_bytes=32 * 1024 * 1024),
        cost_estimate=cost,
    )(*inputs)

    if distill:
        ce_out, kl_out, stats = results
    else:
        ce_out, stats = results
        kl_out = None

    # ---- cheap (B, P) glue: hard-negative mining + masked sums ----
    ce_row = ce_out[:, 0, :P]                             # (B, P)
    pos = conf_t > 0
    num_pos = jnp.sum(pos.astype(jnp.int32), axis=1)      # (B,)
    # NOTE: original PyTorch divides by N unguarded (NaN if no positives);
    # guard only changes the degenerate case.
    N = jnp.maximum(jnp.sum(num_pos).astype(jnp.float32), 1.0)

    # Exact rank-based mining (matches torch semantics up to stable ties).
    # TODO(synk): a single top-k threshold could replace the double argsort,
    # but exact per-row negative counts require a tie/count guard; kept exact.
    loss_c = jnp.where(pos, 0.0, ce_row)
    loss_idx = jnp.argsort(-loss_c, axis=1)               # descending sort
    idx_rank = jnp.argsort(loss_idx, axis=1)              # rank of each prior
    num_neg = jnp.minimum(negpos_ratio * num_pos, P - 1)
    neg = idx_rank < num_neg[:, None]
    sel = jnp.logical_or(pos, neg).astype(jnp.float32)

    loss_ce = jnp.sum(ce_row * sel)
    loss_l = jnp.sum(stats[:, 0, 0])
    if not distill:
        out = (loss_ce + loss_l) / N
        return out, out

    sse_s = jnp.sum(stats[:, 1, 0])
    sse_t = jnp.sum(stats[:, 2, 0])
    hint_sse = jnp.sum(stats[:, 3, 0])
    loss_soft = jnp.sum(kl_out[:, 0, :P] * sel)

    # bounded_regression_loss (scalar branch)
    mse_s = sse_s / (4.0 * N)
    mse_t = sse_t / (4.0 * N)
    loss_br = jnp.where(mse_s + reg_m > mse_t, mse_s * 0.5, 0.0)
    loss_reg = loss_l + loss_br

    loss_hint = hint_sse / float(B * P * C)               # F.mse_loss mean
    loss_cls = u * loss_ce + (1.0 - u) * loss_soft
    loss_ssd = (loss_cls + lmda * loss_reg) / N
    return loss_ssd + 0.5 * loss_hint, (loss_ce + loss_l) / N


# ----------------------------------------------------------------------------
if __name__ == "__main__":
    B, P, C, num_obj = 2, 64, 4, 3

    key = jax.random.PRNGKey(0)
    ks = jax.random.split(key, 9)

    priors_cxcy = jax.random.uniform(ks[0], (P, 2), minval=0.2, maxval=0.8)
    priors_wh = jax.random.uniform(ks[1], (P, 2), minval=0.1, maxval=0.3)
    priors = jnp.concatenate([priors_cxcy, priors_wh], axis=1)

    loc_data = 0.1 * jax.random.normal(ks[2], (B, P, 4), dtype=jnp.float32)
    conf_data = jax.random.normal(ks[3], (B, P, C), dtype=jnp.float32)
    locT = 0.1 * jax.random.normal(ks[4], (B, P, 4), dtype=jnp.float32)
    confT = jax.random.normal(ks[5], (B, P, C), dtype=jnp.float32)

    centers = jax.random.uniform(ks[6], (B, num_obj, 2), minval=0.3, maxval=0.7)
    sizes = jax.random.uniform(ks[7], (B, num_obj, 2), minval=0.1, maxval=0.25)
    mins = centers - sizes / 2.0
    maxs = centers + sizes / 2.0
    labels = jax.random.randint(ks[8], (B, num_obj, 1), 0, C - 1).astype(jnp.float32)
    targets = jnp.concatenate([mins, maxs, labels], axis=2)   # (B, num_obj, 5)

    # distillation path
    out1, out2 = multibox_loss_forward(
        (loc_data, conf_data, priors), (locT, confT), targets,
        num_classes=C, overlap_thresh=0.5, negpos_ratio=3,
        neg_w=1.5, pos_w=1.0, T=1.0, reg_m=0.0, lmda=1.0, u=0.5)

    # plain-SSD path (distillation inputs/compute compiled out)
    nd1, nd2 = multibox_loss_forward(
        (loc_data, conf_data, priors), None, targets,
        num_classes=C, overlap_thresh=0.5, negpos_ratio=3)

    # channel-major path (upstream emits (B, C, P): no transpose pre-pass)
    loc_cm = jnp.transpose(loc_data, (0, 2, 1))
    conf_cm = jnp.transpose(conf_data, (0, 2, 1))
    cm1, cm2 = multibox_loss_forward(
        (loc_cm, conf_cm, priors), None, targets,
        num_classes=C, overlap_thresh=0.5, negpos_ratio=3, channel_major=True)

    out1, out2, nd1, nd2, cm1, cm2 = jax.block_until_ready(
        (out1, out2, nd1, nd2, cm1, cm2))
    assert jnp.isfinite(out1) and jnp.isfinite(out2)
    assert jnp.isfinite(nd1) and jnp.isfinite(nd2)
    assert jnp.allclose(nd1, cm1, rtol=1e-5, atol=1e-5)
    assert jnp.allclose(nd2, cm2, rtol=1e-5, atol=1e-5)
    print("KERNEL_OK")
</pallas_src>

<mosaic_0001>
module attributes {stable_mosaic.version = 11 : i64} {
  func.func @_multibox_kernel(%arg0: i32, %arg1: i32, %arg2: memref<1x4x128xf32, #tpu.memory_space<vmem>>, %arg3: memref<1x4x128xf32, #tpu.memory_space<vmem>>, %arg4: memref<1x4x128xf32, #tpu.memory_space<vmem>>, %arg5: memref<1x4x128xf32, #tpu.memory_space<vmem>>, %arg6: memref<1x4x128xf32, #tpu.memory_space<vmem>>, %arg7: memref<1x1x128xi32, #tpu.memory_space<vmem>>, %arg8: memref<1x1x128xf32, #tpu.memory_space<vmem>>, %arg9: memref<1x1x128xf32, #tpu.memory_space<vmem>>, %arg10: memref<1x8x128xf32, #tpu.memory_space<vmem>>) attributes {dimension_semantics = [#tpu.dimension_semantics<parallel>, #tpu.dimension_semantics<parallel>], iteration_bounds = array<i64: 2, 1>, scalar_prefetch = 0 : i64, scratch_operands = 0 : i64, tpu.core_type = #tpu.core_type<tc>, window_params = [{transform_indices = @transform_0, window_bounds = array<i64: 1, 4, 128>}, {transform_indices = @transform_1, window_bounds = array<i64: 1, 4, 128>}, {transform_indices = @transform_2, window_bounds = array<i64: 1, 4, 128>}, {transform_indices = @transform_3, window_bounds = array<i64: 1, 4, 128>}, {transform_indices = @transform_4, window_bounds = array<i64: 1, 4, 128>}, {transform_indices = @transform_5, window_bounds = array<i64: 1, 1, 128>}, {transform_indices = @transform_6, window_bounds = array<i64: 1, 1, 128>}, {transform_indices = @transform_7, window_bounds = array<i64: 1, 1, 128>}, {transform_indices = @transform_8, window_bounds = array<i64: 1, 8, 128>}]} {
    %c0 = arith.constant 0 : index
    %c0_0 = arith.constant 0 : index
    %c0_1 = arith.constant 0 : index
    %0 = vector.load %arg3[%c0, %c0_0, %c0_1] : memref<1x4x128xf32, #tpu.memory_space<vmem>>, vector<1x4x128xf32>
    %1 = vector.shape_cast %0 : vector<1x4x128xf32> to vector<4x128xf32>
    %c0_2 = arith.constant 0 : index
    %c0_3 = arith.constant 0 : index
    %c0_4 = arith.constant 0 : index
    %2 = vector.load %arg2[%c0_2, %c0_3, %c0_4] : memref<1x4x128xf32, #tpu.memory_space<vmem>>, vector<1x4x128xf32>
    %3 = vector.shape_cast %2 : vector<1x4x128xf32> to vector<4x128xf32>
    %c0_5 = arith.constant 0 : index
    %c0_6 = arith.constant 0 : index
    %c0_7 = arith.constant 0 : index
    %4 = vector.load %arg6[%c0_5, %c0_6, %c0_7] : memref<1x4x128xf32, #tpu.memory_space<vmem>>, vector<1x4x128xf32>
    %5 = vector.shape_cast %4 : vector<1x4x128xf32> to vector<4x128xf32>
    %c0_8 = arith.constant 0 : index
    %c0_9 = arith.constant 0 : index
    %c0_10 = arith.constant 0 : index
    %6 = vector.load %arg7[%c0_8, %c0_9, %c0_10] : memref<1x1x128xi32, #tpu.memory_space<vmem>>, vector<1x1x128xi32>
    %7 = vector.shape_cast %6 : vector<1x1x128xi32> to vector<1x128xi32>
    %c0_i32 = arith.constant 0 : i32
    %8 = vector.broadcast %c0_i32 : i32 to vector<1x128xi32>
    %9 = arith.cmpi sgt, %7, %8 : vector<1x128xi32>
    %10 = arith.extui %9 : vector<1x128xi1> to vector<1x128xi32>
    %11 = arith.sitofp %10 : vector<1x128xi32> to vector<1x128xf32>
    %12 = arith.subf %3, %5 : vector<4x128xf32>
    %13 = math.absf %12 : vector<4x128xf32>
    %14 = arith.mulf %12, %12 : vector<4x128xf32>
    %cst = arith.constant 1.000000e+00 : f32
    %15 = vector.broadcast %cst : f32 to vector<4x128xf32>
    %16 = arith.cmpf olt, %13, %15 : vector<4x128xf32>
    %cst_11 = arith.constant 5.000000e-01 : f32
    %17 = vector.broadcast %cst_11 : f32 to vector<4x128xf32>
    %18 = arith.mulf %17, %14 : vector<4x128xf32>
    %cst_12 = arith.constant 5.000000e-01 : f32
    %19 = vector.broadcast %cst_12 : f32 to vector<4x128xf32>
    %20 = arith.subf %13, %19 : vector<4x128xf32>
    %21 = arith.select %16, %18, %20 : vector<4x128xi1>, vector<4x128xf32>
    %22 = vector.broadcast %11 : vector<1x128xf32> to vector<4x128xf32>
    %23 = arith.mulf %21, %22 : vector<4x128xf32>
    %24 = vector.shape_cast %23 : vector<4x128xf32> to vector<1x4x128xf32>
    %cst_13 = arith.constant dense<0.000000e+00> : vector<1xf32>
    %25 = vector.multi_reduction <add>, %24, %cst_13 [1, 2] : vector<1x4x128xf32> to vector<1xf32>
    %26 = vector.shape_cast %25 : vector<1xf32> to vector<1x1x1xf32>
    %27 = vector.extract %26[0, 0, 0] : f32 from vector<1x1x1xf32>
    %28 = vector.broadcast %11 : vector<1x128xf32> to vector<4x128xf32>
    %29 = arith.mulf %14, %28 : vector<4x128xf32>
    %30 = vector.shape_cast %29 : vector<4x128xf32> to vector<1x4x128xf32>
    %cst_14 = arith.constant dense<0.000000e+00> : vector<1xf32>
    %31 = vector.multi_reduction <add>, %30, %cst_14 [1, 2] : vector<1x4x128xf32> to vector<1xf32>
    %32 = vector.shape_cast %31 : vector<1xf32> to vector<1x1x1xf32>
    %33 = vector.extract %32[0, 0, 0] : f32 from vector<1x1x1xf32>
    %cst_15 = arith.constant dense<0xFF800000> : vector<128xf32>
    %34 = vector.multi_reduction <maximumf>, %1, %cst_15 [0] : vector<4x128xf32> to vector<128xf32>
    %35 = vector.shape_cast %34 : vector<128xf32> to vector<1x128xf32>
    %36 = vector.broadcast %35 : vector<1x128xf32> to vector<4x128xf32>
    %37 = arith.subf %1, %36 : vector<4x128xf32>
    %38 = math.exp %37 : vector<4x128xf32>
    %cst_16 = arith.constant dense<0.000000e+00> : vector<128xf32>
    %39 = vector.multi_reduction <add>, %38, %cst_16 [0] : vector<4x128xf32> to vector<128xf32>
    %40 = vector.shape_cast %39 : vector<128xf32> to vector<1x128xf32>
    %41 = math.log %40 : vector<1x128xf32>
    %42 = arith.addf %41, %35 : vector<1x128xf32>
    %43 = tpu.iota {dimensions = array<i32: 0>} : vector<4x128xi32>
    %44 = vector.broadcast %7 : vector<1x128xi32> to vector<4x128xi32>
    %45 = arith.cmpi eq, %43, %44 : vector<4x128xi32>
    %46 = arith.extui %45 : vector<4x128xi1> to vector<4x128xi32>
    %47 = arith.sitofp %46 : vector<4x128xi32> to vector<4x128xf32>
    %48 = arith.mulf %1, %47 : vector<4x128xf32>
    %cst_17 = arith.constant dense<0.000000e+00> : vector<128xf32>
    %49 = vector.multi_reduction <add>, %48, %cst_17 [0] : vector<4x128xf32> to vector<128xf32>
    %50 = vector.shape_cast %49 : vector<128xf32> to vector<1x128xf32>
    %51 = arith.subf %42, %50 : vector<1x128xf32>
    %c0_18 = arith.constant 0 : index
    %c0_19 = arith.constant 0 : index
    %c0_20 = arith.constant 0 : index
    %52 = vector.load %arg8[%c0_18, %c0_19, %c0_20] : memref<1x1x128xf32, #tpu.memory_space<vmem>>, vector<1x1x128xf32>
    %53 = vector.shape_cast %52 : vector<1x1x128xf32> to vector<1x128xf32>
    %54 = vector.shape_cast %51 : vector<1x128xf32> to vector<1x1x128xf32>
    tpu.vector_store %arg8[%c0_18, %c0_19, %c0_20], %54 {strides = array<i32>} : memref<1x1x128xf32, #tpu.memory_space<vmem>>, vector<1x1x128xf32>,
    %c0_21 = arith.constant 0 : index
    %c0_22 = arith.constant 0 : index
    %c0_23 = arith.constant 0 : index
    %55 = vector.load %arg5[%c0_21, %c0_22, %c0_23] : memref<1x4x128xf32, #tpu.memory_space<vmem>>, vector<1x4x128xf32>
    %56 = vector.shape_cast %55 : vector<1x4x128xf32> to vector<4x128xf32>
    %c0_24 = arith.constant 0 : index
    %c0_25 = arith.constant 0 : index
    %c0_26 = arith.constant 0 : index
    %57 = vector.load %arg4[%c0_24, %c0_25, %c0_26] : memref<1x4x128xf32, #tpu.memory_space<vmem>>, vector<1x4x128xf32>
    %58 = vector.shape_cast %57 : vector<1x4x128xf32> to vector<4x128xf32>
    %59 = vector.broadcast %42 : vector<1x128xf32> to vector<4x128xf32>
    %60 = arith.subf %1, %59 : vector<4x128xf32>
    %cst_27 = arith.constant 1.000000e+00 : f32
    %61 = vector.broadcast %cst_27 : f32 to vector<4x128xf32>
    %62 = arith.mulf %56, %61 : vector<4x128xf32>
    %cst_28 = arith.constant dense<0xFF800000> : vector<128xf32>
    %63 = vector.multi_reduction <maximumf>, %62, %cst_28 [0] : vector<4x128xf32> to vector<128xf32>
    %64 = vector.shape_cast %63 : vector<128xf32> to vector<1x128xf32>
    %65 = vector.broadcast %64 : vector<1x128xf32> to vector<4x128xf32>
    %66 = arith.subf %62, %65 : vector<4x128xf32>
    %67 = math.exp %66 : vector<4x128xf32>
    %cst_29 = arith.constant dense<0.000000e+00> : vector<128xf32>
    %68 = vector.multi_reduction <add>, %67, %cst_29 [0] : vector<4x128xf32> to vector<128xf32>
    %69 = vector.shape_cast %68 : vector<128xf32> to vector<1x128xf32>
    %70 = tpu.reciprocal %69 {approx = true} : vector<1x128xf32> -> vector<1x128xf32>
    %71 = vector.broadcast %70 : vector<1x128xf32> to vector<4x128xf32>
    %72 = arith.mulf %67, %71 : vector<4x128xf32>
    %c0_i32_30 = arith.constant 0 : i32
    %73 = vector.broadcast %c0_i32_30 : i32 to vector<4x128xi32>
    %74 = arith.cmpi eq, %43, %73 : vector<4x128xi32>
    %cst_31 = arith.constant 1.500000e+00 : f32
    %cst_32 = arith.constant 1.000000e+00 : f32
    %75 = vector.broadcast %cst_31 : f32 to vector<4x128xf32>
    %76 = vector.broadcast %cst_32 : f32 to vector<4x128xf32>
    %77 = arith.select %74, %75, %76 : vector<4x128xi1>, vector<4x128xf32>
    %cst_33 = arith.constant 1.000000e-10 : f32
    %78 = vector.broadcast %cst_33 : f32 to vector<4x128xf32>
    %79 = arith.addf %72, %78 : vector<4x128xf32>
    %80 = arith.mulf %77, %79 : vector<4x128xf32>
    %81 = arith.mulf %80, %60 : vector<4x128xf32>
    %cst_34 = arith.constant dense<0.000000e+00> : vector<128xf32>
    %82 = vector.multi_reduction <add>, %81, %cst_34 [0] : vector<4x128xf32> to vector<128xf32>
    %83 = vector.shape_cast %82 : vector<128xf32> to vector<1x128xf32>
    %cst_35 = arith.constant 0.000000e+00 : f32
    %84 = vector.broadcast %cst_35 : f32 to vector<1x128xf32>
    %85 = arith.subf %84, %83 : vector<1x128xf32>
    %c0_36 = arith.constant 0 : index
    %c0_37 = arith.constant 0 : index
    %c0_38 = arith.constant 0 : index
    %86 = vector.load %arg9[%c0_36, %c0_37, %c0_38] : memref<1x1x128xf32, #tpu.memory_space<vmem>>, vector<1x1x128xf32>
    %87 = vector.shape_cast %86 : vector<1x1x128xf32> to vector<1x128xf32>
    %88 = vector.shape_cast %85 : vector<1x128xf32> to vector<1x1x128xf32>
    tpu.vector_store %arg9[%c0_36, %c0_37, %c0_38], %88 {strides = array<i32>} : memref<1x1x128xf32, #tpu.memory_space<vmem>>, vector<1x1x128xf32>,
    %89 = arith.subf %58, %5 : vector<4x128xf32>
    %90 = arith.mulf %89, %89 : vector<4x128xf32>
    %91 = vector.broadcast %11 : vector<1x128xf32> to vector<4x128xf32>
    %92 = arith.mulf %90, %91 : vector<4x128xf32>
    %93 = vector.shape_cast %92 : vector<4x128xf32> to vector<1x4x128xf32>
    %cst_39 = arith.constant dense<0.000000e+00> : vector<1xf32>
    %94 = vector.multi_reduction <add>, %93, %cst_39 [1, 2] : vector<1x4x128xf32> to vector<1xf32>
    %95 = vector.shape_cast %94 : vector<1xf32> to vector<1x1x1xf32>
    %96 = vector.extract %95[0, 0, 0] : f32 from vector<1x1x1xf32>
    %97 = arith.subf %1, %56 : vector<4x128xf32>
    %98 = arith.mulf %97, %97 : vector<4x128xf32>
    %99 = vector.shape_cast %98 : vector<4x128xf32> to vector<1x4x128xf32>
    %cst_40 = arith.constant dense<0.000000e+00> : vector<1xf32>
    %100 = vector.multi_reduction <add>, %99, %cst_40 [1, 2] : vector<1x4x128xf32> to vector<1xf32>
    %101 = vector.shape_cast %100 : vector<1xf32> to vector<1x1x1xf32>
    %102 = vector.extract %101[0, 0, 0] : f32 from vector<1x1x1xf32>
    %103 = tpu.iota {dimensions = array<i32: 1>} : vector<1x8x128xi32>
    %c0_i32_41 = arith.constant 0 : i32
    %104 = vector.broadcast %c0_i32_41 : i32 to vector<1x8x128xi32>
    %105 = arith.cmpi eq, %103, %104 : vector<1x8x128xi32>
    %cst_42 = arith.constant 0.000000e+00 : f32
    %106 = vector.broadcast %27 : f32 to vector<1x8x128xf32>
    %107 = vector.broadcast %cst_42 : f32 to vector<1x8x128xf32>
    %108 = arith.select %105, %106, %107 : vector<1x8x128xi1>, vector<1x8x128xf32>
    %c1_i32 = arith.constant 1 : i32
    %109 = vector.broadcast %c1_i32 : i32 to vector<1x8x128xi32>
    %110 = arith.cmpi eq, %103, %109 : vector<1x8x128xi32>
    %cst_43 = arith.constant 0.000000e+00 : f32
    %111 = vector.broadcast %33 : f32 to vector<1x8x128xf32>
    %112 = vector.broadcast %cst_43 : f32 to vector<1x8x128xf32>
    %113 = arith.select %110, %111, %112 : vector<1x8x128xi1>, vector<1x8x128xf32>
    %114 = arith.addf %108, %113 : vector<1x8x128xf32>
    %c2_i32 = arith.constant 2 : i32
    %115 = vector.broadcast %c2_i32 : i32 to vector<1x8x128xi32>
    %116 = arith.cmpi eq, %103, %115 : vector<1x8x128xi32>
    %cst_44 = arith.constant 0.000000e+00 : f32
    %117 = vector.broadcast %96 : f32 to vector<1x8x128xf32>
    %118 = vector.broadcast %cst_44 : f32 to vector<1x8x128xf32>
    %119 = arith.select %116, %117, %118 : vector<1x8x128xi1>, vector<1x8x128xf32>
    %120 = arith.addf %114, %119 : vector<1x8x128xf32>
    %c3_i32 = arith.constant 3 : i32
    %121 = vector.broadcast %c3_i32 : i32 to vector<1x8x128xi32>
    %122 = arith.cmpi eq, %103, %121 : vector<1x8x128xi32>
    %cst_45 = arith.constant 0.000000e+00 : f32
    %123 = vector.broadcast %102 : f32 to vector<1x8x128xf32>
    %124 = vector.broadcast %cst_45 : f32 to vector<1x8x128xf32>
    %125 = arith.select %122, %123, %124 : vector<1x8x128xi1>, vector<1x8x128xf32>
    %126 = arith.addf %120, %125 : vector<1x8x128xf32>
    %c0_46 = arith.constant 0 : index
    %c0_47 = arith.constant 0 : index
    %c0_48 = arith.constant 0 : index
    %127 = vector.load %arg10[%c0_46, %c0_47, %c0_48] : memref<1x8x128xf32, #tpu.memory_space<vmem>>, vector<1x8x128xf32>
    tpu.vector_store %arg10[%c0_46, %c0_47, %c0_48], %126 {strides = array<i32>} : memref<1x8x128xf32, #tpu.memory_space<vmem>>, vector<1x8x128xf32>,
    return
  }
  func.func @transform_0(%arg0: i32, %arg1: i32) -> (i32, i32, i32) {
    %c0_i32 = arith.constant 0 : i32
    %c0_i32_0 = arith.constant 0 : i32
    return %arg0, %c0_i32, %arg1 : i32, i32, i32
  }
  func.func @transform_1(%arg0: i32, %arg1: i32) -> (i32, i32, i32) {
    %c0_i32 = arith.constant 0 : i32
    %c0_i32_0 = arith.constant 0 : i32
    return %arg0, %c0_i32, %arg1 : i32, i32, i32
  }
  func.func @transform_2(%arg0: i32, %arg1: i32) -> (i32, i32, i32) {
    %c0_i32 = arith.constant 0 : i32
    %c0_i32_0 = arith.constant 0 : i32
    return %arg0, %c0_i32, %arg1 : i32, i32, i32
  }
  func.func @transform_3(%arg0: i32, %arg1: i32) -> (i32, i32, i32) {
    %c0_i32 = arith.constant 0 : i32
    %c0_i32_0 = arith.constant 0 : i32
    return %arg0, %c0_i32, %arg1 : i32, i32, i32
  }
  func.func @transform_4(%arg0: i32, %arg1: i32) -> (i32, i32, i32) {
    %c0_i32 = arith.constant 0 : i32
    %c0_i32_0 = arith.constant 0 : i32
    return %arg0, %c0_i32, %arg1 : i32, i32, i32
  }
  func.func @transform_5(%arg0: i32, %arg1: i32) -> (i32, i32, i32) {
    %c0_i32 = arith.constant 0 : i32
    %c0_i32_0 = arith.constant 0 : i32
    return %arg0, %c0_i32, %arg1 : i32, i32, i32
  }
  func.func @transform_6(%arg0: i32, %arg1: i32) -> (i32, i32, i32) {
    %c0_i32 = arith.constant 0 : i32
    %c0_i32_0 = arith.constant 0 : i32
    return %arg0, %c0_i32, %arg1 : i32, i32, i32
  }
  func.func @transform_7(%arg0: i32, %arg1: i32) -> (i32, i32, i32) {
    %c0_i32 = arith.constant 0 : i32
    %c0_i32_0 = arith.constant 0 : i32
    return %arg0, %c0_i32, %arg1 : i32, i32, i32
  }
  func.func @transform_8(%arg0: i32, %arg1: i32) -> (i32, i32, i32) {
    %c1_i32 = arith.constant 1 : i32
    %0 = arith.muli %arg0, %c1_i32 : i32
    %1 = arith.addi %0, %arg1 : i32
    %c0_i32 = arith.constant 0 : i32
    %c0_i32_0 = arith.constant 0 : i32
    %c0_i32_1 = arith.constant 0 : i32
    return %1, %c0_i32, %c0_i32_0 : i32, i32, i32
  }
}

</mosaic_0001>

<bundles_post_ra>
// kernel: tpu_custom_call.1
= control target key start
LH: loop header
LB: loop body
LE: loop exit
PB: predicated region body
PF: predicated region fallthrough
CT: control target
= control target key end

     0   :  { %s1820_s0 = inlined_call_operand.hbm [shape: f32[2,4,128], index: 0, kind: input, shape index: {}]   ;;  %s1821_s1 = inlined_call_operand.hbm [shape: f32[2,4,128], index: 1, kind: input, shape index: {}]   ;;  %s1822_s2 = inlined_call_operand.hbm [shape: f32[2,4,128], index: 2, kind: input, shape index: {}]   ;;  %s1823_s3 = inlined_call_operand.vmem [shape: f32[2,4,128], index: 3, kind: input, shape index: {}]   ;;  %s1824_s4 = inlined_call_operand.hbm [shape: f32[2,4,128], index: 4, kind: input, shape index: {}]   ;;  %s1825_s5 = inlined_call_operand.vmem [shape: s32[2,1,128], index: 5, kind: input, shape index: {}]   ;;  %s1826_s6 = inlined_call_operand.hbm [shape: f32[2,1,128], index: 6, kind: output, shape index: {0}]   ;;  %s1827_s7 = inlined_call_operand.hbm [shape: f32[2,1,128], index: 7, kind: output, shape index: {1}]   ;;  %s1828_s8 = inlined_call_operand.hbm [shape: f32[2,8,128], index: 8, kind: output, shape index: {2}]  }
   0x1   :  { %1843 = sst [smem:[#allocation26_spill]] %s1821_s1 }
   0x2   :  { %1844 = sst [smem:[#allocation27_spill]] %s1826_s6 }
   0x3   :  { %1845 = sst [smem:[#allocation28_spill]] %s1828_s8 }
   0x4   :  { %14 = vsyncpa [#allocation3], 0 }
   0x5   :  { %16 = vsyncpa [#allocation3 + $0x1], 0 }
   0x6   :  { %17 = vsyncpa [#allocation6], 0 }
   0x7   :  { %19 = vsyncpa [#allocation6 + $0x1], 0 }
   0x8   :  { %20 = vsyncpa [#allocation9], 0 }
   0x9   :  { %22 = vsyncpa [#allocation9 + $0x1], 0 }
   0xa   :  { %23 = vsyncpa [#allocation4], 0 }
   0xb   :  { %25 = vsyncpa [#allocation4 + $0x1], 0 }
   0xc   :  { %26 = vsyncpa [#allocation12], 0 }
   0xd   :  { %28 = vsyncpa [#allocation12 + $0x1], 0  ;;  %s1428_s27 = smov 0   ;;  %s1430_s28 = smov 0  }
   0xe   :  { %s1432_s29 = smov 0   ;;  %s1434_s30 = smov 0  }
   0xf   :  { %s1436_s9 = smov 0   ;;  %s1438_s10 = smov 0  }
  0x10 LB: > { %1846 = sst [smem:[#allocation19_spill]] %s1352_s27  ;;  %s1459_s11 = sadd.s32 4294967295, %s1372_s10   ;;  %s1372_s10 = sphi %s1438_s10, %s34_s10   ;;  %s1368_s9 = sphi %s1436_s9, %s1879_s9   ;;  %s1364_s30 = sphi %s1434_s30, %s1878_s30   ;;  %s1360_s29 = sphi %s1432_s29, %s1877_s29   ;;  %s1356_s28 = sphi %s1430_s28, %s1881_s28   ;;  %s1352_s27 = sphi %s1428_s27, %s1880_s27  }
  0x11   : > { %1847 = sst [smem:[#allocation20_spill]] %s1360_s29  ;;  %s1829_s12 = sadd.s32 4294967294, %s1372_s10  }
  0x12   : > { %1848 = sst [smem:[#allocation21_spill]] %s1368_s9  ;;  %s46_s13 = sadd.s32 1, %s1368_s9 }
  0x13   : > { %1849 = sst [smem:[#allocation22_spill]] %s1372_s10  ;;  %s55_s14 = sadd.s32 1, %s1360_s29 }
  0x14   : > { %p48_p0 = scmp.ge.s32.totalorder %s46_s13, 2  ;;  %p62_p1 = scmp.ne.s32.totalorder %s1360_s29, %s1356_s28 }
  0x15   : > { %p63_p2 = scmp.eq.s32.totalorder %s1372_s10, 0  ;;  %p68_p3 = scmp.ne.s32.totalorder %s1356_s28, %s1352_s27 }
  0x16   : > { %s1883_s13 = smov (%p48_p0, %s46_s13), 0  ;;  %p69_p5 = scmp.eq.s32.totalorder %s1459_s11, 0 }
  0x17   : > { %1850 = sst [smem:[#allocation23_spill]] %s1883_s13  ;;  %p1471_p4 = por %p63_p2, %p62_p1 }
  0x18   : > { %s50_s16 = ssub.s32 %s1368_s9, %s1883_s13  ;;  %p234_p6 = scmp.eq.s32.totalorder %s1459_s11, 1 }
  0x19   : > { %p53_p7 = scmp.eq.s32.totalorder %s50_s16, 0  ;;  %p1479_p8 = por %p69_p5, %p68_p3 }
  0x1a   : > { %p1483_p9 = por %p234_p6, %p62_p1  ;;  %p240_p10 = scmp.eq.s32.totalorder %s1829_s12, 1 }
  0x1b   : > { %s1852_s17 = scalar_select %p1479_p8, 1, 0 }
  0x1c   : > { %s1853_s18 = scalar_select %p1483_p9, 1, 0 }
  0x1d   : > { %s1490_s19 = scalar_select %p53_p7, %s1360_s29, %s55_s14  }
  0x1e   : > { %p1492_p11 = por %p240_p10, %p68_p3  ;;  %p1042_p13 = scmp.lt.s32.totalorder %s1372_s10, 2 }
  0x1f   : > { %1854 = sst [smem:[#allocation24_spill]] %s1490_s19  ;;  %s1499_s21 = sand.u32 1, %s1360_s29  }
  0x20   : > { %s1855_s20 = scalar_select %p1492_p11, 1, 0 }
  0x21   : > { %s1502_s22 = sshll.u32 %s1499_s21, 2  ;;  %s1505_s23 = sshll.u32 %s1368_s9, 6 }
  0x22   : > { %1856 = sst [smem:[#allocation25_spill]] %s1855_s20  ;;  %p1509_p0 = pnand %p1042_p13, %p1471_p4 }
  0x23   : > { %s335_s25 = sand.u32 1, %s1372_s10   ;;  %s1858_s1 = sld [smem:[#allocation26_spill]] }
  0x24   : > { %s1857_s24 = scalar_select %p1509_p0, 1, 0 }
  0x25   : > { %s339_s12 = scalar_lea.vmem [#allocation5], %s1502_s22  ;;  %s1525_s15 = scalar_lea.sflag [#allocation6], %s335_s25 }
  0x26   : > { %s347_s13 = sshll.u32 %s339_s12, 4  ;;  %p1531_p4 = pneg %p1509_p0  ;;  %s1522_s13 = int_to_ptr.vmem [resolvable:$true] %s347_s13 }
  0x29   : > { %s1518_s16 = scalar_lea.hbm %s1858_s1, %s1505_s23  ;;  %s1107_s12 = scalar_lea.hbm %s1858_s1, 128 }
  0x2a   : > { %s1102_s9 = scalar_lea.hbm %s1518_s16, 64  ;;  %p1108_p7 = scmp.lt.u32.totalorder %s1518_s16, %s1858_s1 }
  0x2b   : > { %p1103_p3 = scmp.ne.s32.totalorder %s1518_s16, %s1102_s9  ;;  %p1109_p10 = scmp.lt.u32.totalorder %s1107_s12, %s1102_s9 }
  0x2c   : > { %p1111_p12 = scmp.lt.u32.totalorder %s1102_s9, %s1518_s16 }
  0x2d   : > { %p1105_p5 = pnand %p1531_p4, %p1103_p3  ;;  %p1110_p13 = por %p1109_p10, %p1108_p7 }
  0x2f   : > { %p1106_p6 = pneg %p1105_p5  ;;  %p1112_p1 = por %p1111_p12, %p1110_p13 }
  0x31   : > { %p1113_p2 = pnand %p1112_p1, %p1106_p6 }
  0x33   : > { %1116 = shalt.err (!%p1113_p2)
}
  0x34   : > { %s1117_s25 = scalar_lea.vmem %s1522_s13, 64  ;;  %s1374_s26 = smov [#allocation5]  }
  0x35   : > { %p1118_p3 = scmp.ne.s32.totalorder %s1522_s13, %s1117_s25  ;;  %s1122_s14 = sshll.u32 %s1374_s26, 4  ;;  %s1123_s14 = int_to_ptr.vmem [resolvable:$false] %s1122_s14 }
  0x36   : > { %s1124_s29 = scalar_lea.vmem %s1123_s14, 128  ;;  %p1125_p9 = scmp.lt.s32.totalorder %s1522_s13, %s1123_s14 }
  0x37   : > { %p1120_p5 = pnand %p1118_p3, %p1531_p4  ;;  %p1126_p8 = scmp.lt.s32.totalorder %s1124_s29, %s1117_s25 }
  0x39   : > { %p1121_p11 = pneg %p1120_p5  ;;  %p1127_p7 = por %p1126_p8, %p1125_p9 }
  0x3b   : > { %p1128_p10 = pnand %p1127_p7, %p1121_p11 }
  0x3d   : > { %1131 = shalt.err (!%p1128_p10)
}
  0x3e   : > { %1025 = dma.hbm_to_vmem [thread:$0]  (!%p1509_p0), %s1518_s16, 64, %s1522_s13, %s1525_s15  }
  0x3f   : > { %p1860_p12 = scmp.lt.s32.totalorder %s1372_s10, 3  ;;  %p1861_p1 = scmp.ge.s32.totalorder %s1372_s10, 1 }
  0x40   : > { %s1567_s25 = scalar_lea.hbm %s1820_s0, %s1505_s23  ;;  %s320_s26 = scalar_lea.vmem [#allocation2], %s1502_s22 }
  0x41   : > { %p1559_p2 = pnand %p1861_p1, %p1860_p12  ;;  %s328_s14 = sshll.u32 %s320_s26, 4  ;;  %s1570_s14 = int_to_ptr.vmem [resolvable:$true] %s328_s14 }
  0x42   : > { %s1576_s29 = scalar_lea.hbm %s1822_s2, %s1505_s23  ;;  %s317_s1 = scalar_lea.sflag [#allocation3], %s1499_s21 }
  0x43   : > { %s1862_s9 = scalar_select %p1559_p2, 1, 0 }
  0x44   : > { %s1132_s10 = scalar_lea.hbm %s1567_s25, 64  ;;  %s1137_s27 = scalar_lea.hbm %s1820_s0, 128 }
  0x45   : > { %p1133_p8 = scmp.ne.s32.totalorder %s1567_s25, %s1132_s10  ;;  %p1138_p6 = scmp.lt.u32.totalorder %s1567_s25, %s1820_s0 }
  0x46   : > { %p1139_p13 = scmp.lt.u32.totalorder %s1137_s27, %s1132_s10  ;;  %p1141_p5 = scmp.lt.u32.totalorder %s1132_s10, %s1567_s25 }
  0x47   : > { %p1135_p9 = pnand %p1133_p8, %p1531_p4 }
  0x48   : > { %p1140_p3 = por %p1139_p13, %p1138_p6 }
  0x49   : > { %p1136_p11 = pneg %p1135_p9 }
  0x4a   : > { %p1142_p7 = por %p1141_p5, %p1140_p3 }
  0x4c   : > { %p1143_p10 = pnand %p1142_p7, %p1136_p11 }
  0x4e   : > { %1146 = shalt.err (!%p1143_p10)
}
  0x4f   : > { %s1147_s26 = scalar_lea.vmem %s1570_s14, 64  ;;  %s1375_s13 = smov [#allocation2]  }
  0x50   : > { %p1148_p12 = scmp.ne.s32.totalorder %s1570_s14, %s1147_s26  ;;  %s1152_s16 = sshll.u32 %s1375_s13, 4  ;;  %s1153_s16 = int_to_ptr.vmem [resolvable:$false] %s1152_s16 }
  0x51   : > { %s1154_s6 = scalar_lea.vmem %s1153_s16, 128  ;;  %p1155_p9 = scmp.lt.s32.totalorder %s1570_s14, %s1153_s16 }
  0x52   : > { %p1150_p1 = pnand %p1148_p12, %p1531_p4  ;;  %p1156_p2 = scmp.lt.s32.totalorder %s1154_s6, %s1147_s26 }
  0x54   : > { %p1151_p8 = pneg %p1150_p1  ;;  %p1157_p6 = por %p1156_p2, %p1155_p9 }
  0x56   : > { %p1158_p13 = pnand %p1157_p6, %p1151_p8 }
  0x58   : > { %1161 = shalt.err (!%p1158_p13)
}
  0x59   : > { %1022 = dma.hbm_to_vmem [thread:$0]  (!%p1509_p0), %s1567_s25, 64, %s1570_s14, %s317_s1  }
  0x5a   : > { %s358_s8 = scalar_lea.vmem [#allocation7], %s1502_s22  ;;  %s1162_s10 = scalar_lea.hbm %s1576_s29, 64 }
  0x5b   : > { %s366_s27 = sshll.u32 %s358_s8, 4  ;;  %p1163_p11 = scmp.ne.s32.totalorder %s1576_s29, %s1162_s10  ;;  %s367_s27 = int_to_ptr.vmem [resolvable:$true] %s366_s27 }
  0x5c   : > { %s1167_s26 = scalar_lea.hbm %s1822_s2, 128  ;;  %p1168_p5 = scmp.lt.u32.totalorder %s1576_s29, %s1822_s2 }
  0x5d   : > { %p1165_p2 = pnand %p1163_p11, %p1531_p4  ;;  %p1169_p7 = scmp.lt.u32.totalorder %s1167_s26, %s1162_s10 }
  0x5e   : > { %p1171_p12 = scmp.lt.u32.totalorder %s1162_s10, %s1576_s29 }
  0x5f   : > { %p1166_p3 = pneg %p1165_p2  ;;  %p1170_p10 = por %p1169_p7, %p1168_p5 }
  0x61   : > { %p1172_p1 = por %p1171_p12, %p1170_p10 }
  0x63   : > { %p1173_p8 = pnand %p1172_p1, %p1166_p3 }
  0x65   : > { %1176 = shalt.err (!%p1173_p8)
}
  0x66   : > { %s1177_s1 = scalar_lea.vmem %s367_s27, 64  ;;  %s1376_s25 = smov [#allocation7]  }
  0x67   : > { %p1178_p9 = scmp.ne.s32.totalorder %s367_s27, %s1177_s1  ;;  %s1182_s14 = sshll.u32 %s1376_s25, 4  ;;  %s1183_s14 = int_to_ptr.vmem [resolvable:$false] %s1182_s14 }
  0x68   : > { %s1184_s6 = scalar_lea.vmem %s1183_s14, 128  ;;  %p1185_p11 = scmp.lt.s32.totalorder %s367_s27, %s1183_s14 }
  0x69   : > { %p1180_p6 = pnand %p1178_p9, %p1531_p4  ;;  %p1186_p2 = scmp.lt.s32.totalorder %s1184_s6, %s1177_s1 }
  0x6b   : > { %p1181_p13 = pneg %p1180_p6  ;;  %p1187_p0 = por %p1186_p2, %p1185_p11 }
  0x6d   : > { %p1188_p5 = pnand %p1187_p0, %p1181_p13 }
  0x6f   : > { %1191 = shalt.err (!%p1188_p5)
}
  0x70   : > { %p1863_p7 = scmp.ne.s32.totalorder %s1857_s24, 0  ;;  %s1623_s20 = scalar_lea.hbm %s1824_s4, %s1505_s23 }
  0x71   : > { %s387_s12 = scalar_lea.vmem [#allocation8], %s1502_s22  ;;  %s384_s13 = scalar_lea.sflag [#allocation9], %s1499_s21 }
  0x72   : > { %1028 = dma.hbm_to_vmem [thread:$0]  (!%p1863_p7), %s1576_s29, 64, %s367_s27, %s1525_s15  }
  0x73   : > { %s395_s26 = sshll.u32 %s387_s12, 4  ;;  %s1192_s16 = scalar_lea.hbm %s1623_s20, 64  ;;  %s396_s26 = int_to_ptr.vmem [resolvable:$true] %s395_s26 }
  0x74   : > { %p1193_p0 = scmp.ne.s32.totalorder %s1623_s20, %s1192_s16  ;;  %s1197_s29 = scalar_lea.hbm %s1824_s4, 128 }
  0x75   : > { %p1198_p12 = scmp.lt.u32.totalorder %s1623_s20, %s1824_s4  ;;  %p1199_p1 = scmp.lt.u32.totalorder %s1197_s29, %s1192_s16 }
  0x76   : > { %p1195_p3 = pnand %p1193_p0, %p1531_p4  ;;  %p1201_p9 = scmp.lt.u32.totalorder %s1192_s16, %s1623_s20 }
  0x77   : > { %p1200_p8 = por %p1199_p1, %p1198_p12 }
  0x78   : > { %p1196_p10 = pneg %p1195_p3 }
  0x79   : > { %p1202_p6 = por %p1201_p9, %p1200_p8 }
  0x7b   : > { %p1203_p13 = pnand %p1202_p6, %p1196_p10 }
  0x7d   : > { %1206 = shalt.err (!%p1203_p13)
}
  0x7e   : > { %s1207_s21 = scalar_lea.vmem %s396_s26, 64  ;;  %s1377_s22 = smov [#allocation8]  }
  0x7f   : > { %p1208_p11 = scmp.ne.s32.totalorder %s396_s26, %s1207_s21  ;;  %s1212_s25 = sshll.u32 %s1377_s22, 4  ;;  %s1213_s25 = int_to_ptr.vmem [resolvable:$false] %s1212_s25 }
  0x80   : > { %s1214_s14 = scalar_lea.vmem %s1213_s25, 128  ;;  %p1215_p0 = scmp.lt.s32.totalorder %s396_s26, %s1213_s25 }
  0x81   : > { %p1210_p2 = pnand %p1208_p11, %p1531_p4  ;;  %p1216_p3 = scmp.lt.s32.totalorder %s1214_s14, %s1207_s21 }
  0x83   : > { %p1211_p5 = pneg %p1210_p2  ;;  %p1217_p7 = por %p1216_p3, %p1215_p0 }
  0x85   : > { %p1218_p1 = pnand %p1217_p7, %p1211_p5 }
  0x87   : > { %1221 = shalt.err (!%p1218_p1)
}
  0x88   : > { %p1864_p12 = scmp.ne.s32.totalorder %s1857_s24, 0  ;;  %p1865_p10 = scmp.ne.s32.totalorder %s1862_s9, 0 }
  0x89   : > { %s1647_s19 = sand.u32 (!%p1865_p10), 1, %s1356_s28   ;;  %p1866_p4 = scmp.ne.s32.totalorder (!%p1865_p10), %s1852_s17, 0 }
  0x8a   : > { %1031 = dma.hbm_to_vmem [thread:$0]  (!%p1864_p12), %s1623_s20, 64, %s396_s26, %s384_s13  }
  0x8b   : > { %413 = sbr.rel (%p1865_p10) target bundleno = 396 (0x18c), region = 44  ;;  %s1650_s6 = sshll.u32 (!%p1865_p10), %s1647_s19, 2 }
  0x8c   : > { %s416_s8 = scalar_lea.sflag (!%p1865_p10), [#allocation3], %s1647_s19  ;;  %s419_s10 = scalar_lea.vmem (!%p1865_p10), [#allocation2], %s1650_s6 }
  0x92   : > { %1331 = dma.done.wait (%p1866_p4), %s416_s8, 64  }
  0x93   : > { %1333 = vsyncadd (%p1866_p4), %s416_s8, 4294967232  ;;  %s424_s24 = sand.u32 1, %s1459_s11   ;;  %s428_s20 = scalar_lea.vmem [#allocation5], %s1650_s6 }
  0x94   : > { %s425_s9 = scalar_lea.sflag [#allocation6], %s424_s24 }
  0x95   : > { %1335 = dma.done.wait (%p1866_p4), %s425_s9, 128  }
  0x96   : > { %1337 = vsyncadd (%p1866_p4), %s425_s9, 4294967168  ;;  %s437_s12 = scalar_lea.vmem [#allocation7], %s1650_s6  ;;  %s443_s26 = scalar_lea.sflag [#allocation9], %s1647_s19 }
  0x97   : > { %s446_s13 = scalar_lea.vmem [#allocation8], %s1650_s6 }
  0x98   : > { %1339 = dma.done.wait (%p1866_p4), %s443_s26, 64  }
  0x99   : > { %1341 = vsyncadd (%p1866_p4), %s443_s26, 4294967232  ;;  %p515_p7 = scmp.lt.s32.totalorder %s1364_s30, 1  ;;  %v544_v0 = vlaneseq  ;;  %v531_v3 = vld [vmem:[%s446_s13] sm:$0xf]  ;;  %v612_v5 = vld [vmem:[%s437_s12] sm:$0xf] }
  0x9a   : > { %v647_v7 = vsub.f32 %v612_v5, %v531_v3  ;;  %v530_v8 = vld [vmem:[%s419_s10] sm:$0xf]  ;;  %v1378_v9 = vmov 0.0   ;;  %vm550_vm1 = vcmask 1043456   ;;  %v1684_v12 = vld [vmem:[%s428_s20] sm:$0xf] }
  0x9b   : > { %s516_s16 = scalar_select %p515_p7, %s1364_s30, 1  ;;  %v1675_v1 = vshrl.u32 %v544_v0, 7  ;;  %v536_v11 = vsub.f32 %v530_v8, %v531_v3  ;;  %v572_v37 = vsel %vm550_vm1, %v1684_v12, -inf }
  0x9c   : > { %v648_v15 = vmul.f32 %v647_v7, %v647_v7  ;;  %v573_v39 = vrot.slane %v572_v37, 4  ;;  %v1379_v7 = vmov 1.0   ;;  %s992_s17 = sshll.u32 %s1364_s30, 4  ;;  %s507_s8 = scalar_lea.vmem [#allocation11], %s1647_s19 }
  0x9d   : > { %s527_s29 = scalar_lea.vmem %s1825_s5, %s516_s16  ;;  %s987_s27 = sshll.u32 %s516_s16, 2  ;;  %v546_v2 = vsub.s32 0, %v1675_v1  ;;  %v538_v18 = vmul.f32 %v536_v11, %v536_v11  ;;  %v537_v19 = vand.u32 2147483647, %v536_v11  ;;  %vm633_vm4 = vcmp.eq.s32.totalorder %v1675_v1, 0 }
  0x9e   : > { %s521_s22 = scalar_lea.vmem %s1823_s3, %s987_s27  ;;  %v532_v4 = vld [vmem:[%s527_s29] sm:$0x1]  ;;  %v574_v41 = vmax.f32 %v572_v37, %v573_v39  ;;  %v634_v8 = vsel %vm633_vm4, 1.5, %v1379_v7  ;;  %s1714_s6 = scalar_lea.hbm %s1827_s7, %s992_s17 }
  0x9f   : > { %vm533_vm0 = vcmp.gt.s32.totalorder %v532_v4, 0  ;;  %v597_v6 = vrot.slane %v532_v4, %v546_v2  ;;  %v611_v13 = vld [vmem:[%s521_s22] sm:$0xf]  ;;  %vm539_vm3 = vcmp.lt.f32.partialorder %v537_v19, 1.0  ;;  %v540_v23 = vmul.f32 0.5, %v538_v18  ;;  %s724_s10 = sshll.u32 %s507_s8, 4  ;;  %s725_s10 = int_to_ptr.vmem [resolvable:$true] %s724_s10 }
  0xa0   : > { %v988_v10 = vsel %vm533_vm0, 1.0, %v1378_v9  ;;  %v614_v16 = vsel %vm550_vm1, %v611_v13, -inf  ;;  %v660_v22 = vsub.f32 %v1684_v12, %v611_v13  ;;  %v989_v24 = vadd.f32 -0.5, %v537_v19  ;;  %s1719_s9 = scalar_lea.sflag [#allocation12], %s424_s24  ;;  %s1222_s20 = scalar_lea.vmem %s725_s10, 16 }
  0xa1   : > { %v547_v14 = vrot.slane %v988_v10, %v546_v2  ;;  %vm598_vm2 = vcmp.eq.s32.totalorder %v1675_v1, %v597_v6  ;;  %v615_v20 = vrot.slane %v614_v16, 4  ;;  %v575_v43 = vrot.slane %v574_v41, 2  ;;  %p1223_p8 = scmp.ne.s32.totalorder %s725_s10, %s1222_s20  ;;  %p1867_p9 = scmp.ne.s32.totalorder %s1853_s18, 0 }
  0xa2   : > { %v1688_v17 = vsel %vm598_vm2, 1.0, %v1378_v9  ;;  %v661_v27 = vmul.f32 %v660_v22, %v660_v22  ;;  %v542_v28 = vsel %vm539_vm3, %v540_v23, %v989_v24  ;;  %s1380_s12 = smov [#allocation11]  }
  0xa3   : > { %v649_v21 = vmul.f32 %v648_v15, %v547_v14  ;;  %v616_v26 = vmax.f32 %v614_v16, %v615_v20  ;;  %v549_v29 = vmul.f32 %v547_v14, %v542_v28  ;;  %v561_v31 = vmul.f32 %v547_v14, %v538_v18  ;;  %p1224_p6 = pnand %p1223_p8, %p1867_p9  ;;  %s1226_s26 = sshll.u32 %s1380_s12, 4  ;;  %s1227_s26 = int_to_ptr.vmem [resolvable:$false] %s1226_s26 }
  0xa4   : > { %v662_v30 = vsel %vm550_vm1, %v661_v27, 0.0  ;;  %v576_v44 = vmax.f32 %v574_v41, %v575_v43  ;;  %v601_v11 = vmul.f32 %v1688_v17, %v1684_v12  ;;  %s1228_s13 = scalar_lea.vmem %s1227_s26, 32  ;;  %p1229_p11 = scmp.lt.s32.totalorder %s725_s10, %s1227_s26 }
  0xa5   : > { %v650_v25 = vsel %vm550_vm1, %v649_v21, 0.0  ;;  %v551_v32 = vsel %vm550_vm1, %v549_v29, 0.0  ;;  %v617_v33 = vrot.slane %v616_v26, 2  ;;  %v562_v34 = vsel %vm550_vm1, %v561_v31, 0.0  ;;  %p1225_p13 = pneg %p1224_p6  ;;  %p1230_p2 = scmp.lt.s32.totalorder %s1228_s13, %s1222_s20 }
  0xa6   : > { %651 = vadd.xlane.f32.xlu1 %v650_v25  ;;  %552 = vadd.xlane.f32.xlu0 %v551_v32  ;;  %v577_v45 = vrot.slane %v576_v44, 1  ;;  %v602_v16 = vsel %vm550_vm1, %v601_v11, 0.0 }
  0xa7   : > { %v618_v35 = vmax.f32 %v616_v26, %v617_v33  ;;  %v603_v19 = vrot.slane %v602_v16, 4  ;;  %p1231_p5 = por %p1230_p2, %p1229_p11 }
  0xa8   : > { %v578_v46 = vmax.f32 %v576_v44, %v577_v45 }
  0xa9   : > { %v619_v36 = vrot.slane %v618_v35, 1  ;;  %v604_v21 = vadd.f32 %v603_v19, %v602_v16  ;;  %p1232_p0 = pnand %p1231_p5, %p1225_p13 }
  0xaa   : > { %663 = vadd.xlane.f32.xlu1 %v662_v30  ;;  %563 = vadd.xlane.f32.xlu0 %v562_v34  ;;  %v579_v47 = vsub.f32 %v1684_v12, %v578_v46 }
  0xab   : > { %v620_v38 = vmax.f32 %v618_v35, %v619_v36  ;;  %v605_v23 = vrot.slane %v604_v21, 2 }
  0xac   : > { %v580_v48 = vmul.f32 1.442695, %v579_v47 }
  0xad   : > { %v621_v40 = vsub.f32 %v611_v13, %v620_v38  ;;  %v606_v25 = vadd.f32 %v605_v23, %v604_v21 }
  0xaf   : > { %v622_v42 = vmul.f32 1.442695, %v621_v40  ;;  %v607_v17 = vrot.slane %v606_v25, 1 }
  0xb1   : > { %1094 = vpow2.f32 %v622_v42  ;;  %v608_v27 = vadd.f32 %v607_v17, %v606_v25 }
  0xb2   : > { %1096 = vpow2.f32 %v580_v48 }
  0xbb   : > { %v1095_v49 = vpop.eup %1094 }
  0xbc   : > { %v624_v50 = vsel %vm550_vm1, %v1095_v49, 0.0  ;;  %v1097_v52 = vpop.eup %1096 }
  0xbd   : > { %v625_v51 = vrot.slane %v624_v50, 4  ;;  %v582_v53 = vsel %vm550_vm1, %v1097_v52, 0.0 }
  0xbe   : > { %v583_v55 = vrot.slane %v582_v53, 4 }
  0xbf   : > { %v626_v54 = vadd.f32 %v625_v51, %v624_v50 }
  0xc0   : > { %v584_v56 = vadd.f32 %v583_v55, %v582_v53 }
  0xc1   : > { %v627_v58 = vrot.slane %v626_v54, 2 }
  0xc2   : > { %v585_v57 = vrot.slane %v584_v56, 2 }
  0xc3   : > { %v628_v60 = vadd.f32 %v627_v58, %v626_v54 }
  0xc4   : > { %v586_v59 = vadd.f32 %v585_v57, %v584_v56 }
  0xc5   : > { %v629_v62 = vrot.slane %v628_v60, 1 }
  0xc6   : > { %v587_v61 = vrot.slane %v586_v59, 1 }
  0xc7   : > { %v630_v0 = vadd.f32 %v629_v62, %v628_v60 }
  0xc8   : > { %v588_v63 = vadd.f32 %v587_v61, %v586_v59 }
  0xca   : > { %1098 = vlog2.f32 %v588_v63 }
  0xcb   : > { %1100 = vrcp.f32 %v630_v0 }
  0xd4   : > { %v1099_v2 = vpop.eup %1098 }
  0xd5   : > { %v1101_v3 = vpop.eup %1100  ;;  %v590_v4 = vmul.f32 0.6931472, %v1099_v2 }
  0xd6   : > { %v632_v5 = vmul.f32 %v1101_v3, %v1095_v49 }
  0xd7   : > { %v591_v6 = vadd.f32 %v590_v4, %v578_v46 }
  0xd8   : > { %v635_v9 = vadd.f32 1e-10, %v632_v5 }
  0xd9   : > { %v613_v10 = vsub.f32 %v1684_v12, %v591_v6  ;;  %v609_v29 = vsub.f32 %v591_v6, %v608_v27 }
  0xda   : > { %v636_v13 = vmul.f32 %v635_v9, %v634_v8 }
  0xdc   : > { %v637_v14 = vmul.f32 %v636_v13, %v613_v10 }
  0xde   : > { %v638_v15 = vsel %vm550_vm1, %v637_v14, 0.0 }
  0xdf   : > { %v639_v18 = vrot.slane %v638_v15, 4 }
  0xe1   : > { %v640_v20 = vadd.f32 %v639_v18, %v638_v15 }
  0xe3   : > { %v641_v22 = vrot.slane %v640_v20, 2 }
  0xe5   : > { %v642_v24 = vadd.f32 %v641_v22, %v640_v20 }
  0xe7   : > { %v643_v12 = vrot.slane %v642_v24, 1 }
  0xe9   : > { %v644_v26 = vadd.f32 %v643_v12, %v642_v24 }
  0xeb   : > { %v645_v28 = vsub.f32 0.0, %v644_v26 }
  0xed   : > { %646 = vst [vmem:[%s507_s8] sm:$0x1] %v645_v28 }
  0xee   : > { %1235 = shalt.err (!%p1232_p0)
}
  0xef   : > { %s1236_s11 = scalar_lea.hbm %s1714_s6, 16  ;;  %s1240_s1 = scalar_lea.hbm %s1827_s7, 32 }
  0xf0   : > { %p1237_p3 = scmp.ne.s32.totalorder %s1714_s6, %s1236_s11  ;;  %p1241_p10 = scmp.lt.u32.totalorder %s1714_s6, %s1827_s7 }
  0xf1   : > { %p1242_p4 = scmp.lt.u32.totalorder %s1240_s1, %s1236_s11  ;;  %p1244_p8 = scmp.lt.u32.totalorder %s1236_s11, %s1714_s6 }
  0xf2   : > { %p1238_p1 = pnand %p1237_p3, %p1867_p9 }
  0xf3   : > { %p1243_p7 = por %p1242_p4, %p1241_p10 }
  0xf4   : > { %p1239_p12 = pneg %p1238_p1 }
  0xf5   : > { %p1245_p6 = por %p1244_p8, %p1243_p7 }
  0xf7   : > { %p1246_p13 = pnand %p1245_p6, %p1239_p12 }
  0xf9   : > { %1249 = shalt.err (!%p1246_p13)
}
  0xfa   : > { %1014 = dma.vmem_to_hbm [thread:$0]  (%p1867_p9), %s725_s10, 16, %s1714_s6, %s1719_s9  }
  0xfb   : > { %s501_s27 = scalar_lea.vmem [#allocation10], %s1647_s19  ;;  %s1868_s22 = sld [smem:[#allocation27_spill]] }
  0xfc   : > { %610 = vst [vmem:[%s501_s27] sm:$0x1] %v609_v29  ;;  %s710_s14 = sshll.u32 %s501_s27, 4  ;;  %s688_s8 = scalar_lea.sflag [#allocation4], %s1647_s19  ;;  %s711_s14 = int_to_ptr.vmem [resolvable:$true] %s710_s14 }
  0xfd   : > { %s1250_s20 = scalar_lea.vmem %s711_s14, 16  ;;  %s1381_s12 = smov [#allocation10]  }
  0xfe   : > { %p1251_p11 = scmp.ne.s32.totalorder %s711_s14, %s1250_s20  ;;  %s1254_s26 = sshll.u32 %s1381_s12, 4  ;;  %s1255_s26 = int_to_ptr.vmem [resolvable:$false] %s1254_s26 }
  0xff   : > { %s1256_s6 = scalar_lea.vmem %s1255_s26, 32  ;;  %p1257_p0 = scmp.lt.s32.totalorder %s711_s14, %s1255_s26 }
 0x100   : > { %p1252_p2 = pnand %p1251_p11, %p1867_p9  ;;  %p1258_p3 = scmp.lt.s32.totalorder %s1256_s6, %s1250_s20 }
 0x101   : > { %s1745_s25 = scalar_lea.hbm %s1868_s22, %s992_s17 }
 0x102   : > { %p1253_p5 = pneg %p1252_p2  ;;  %p1259_p1 = por %p1258_p3, %p1257_p0 }
 0x104   : > { %p1260_p12 = pnand %p1259_p1, %p1253_p5 }
 0x106   : > { %1263 = shalt.err (!%p1260_p12)
}
 0x107   : > { %s1264_s17 = scalar_lea.hbm %s1745_s25, 16  ;;  %s1268_s11 = scalar_lea.hbm %s1868_s22, 32 }
 0x108   : > { %p1265_p10 = scmp.ne.s32.totalorder %s1745_s25, %s1264_s17  ;;  %p1269_p8 = scmp.lt.u32.totalorder %s1745_s25, %s1868_s22 }
 0x109   : > { %p1270_p6 = scmp.lt.u32.totalorder %s1268_s11, %s1264_s17  ;;  %p1272_p11 = scmp.lt.u32.totalorder %s1264_s17, %s1745_s25 }
 0x10a   : > { %p1266_p4 = pnand %p1265_p10, %p1867_p9 }
 0x10b   : > { %p1271_p13 = por %p1270_p6, %p1269_p8 }
 0x10c   : > { %p1267_p7 = pneg %p1266_p4 }
 0x10d   : > { %p1273_p2 = por %p1272_p11, %p1271_p13 }
 0x10f   : > { %p1274_p5 = pnand %p1273_p2, %p1267_p7 }
 0x111   : > { %1277 = shalt.err (!%p1274_p5)
}
 0x112   : > { %1013 = dma.vmem_to_hbm [thread:$0]  (%p1867_p9), %s711_s14, 16, %s1745_s25, %s688_s8   ;;  %vm674_vm5 = vcmp.eq.s32.totalorder %v1675_v1, 1  ;;  %vm678_vm6 = vcmp.eq.s32.totalorder %v1675_v1, 2  ;;  %vm682_vm7 = vcmp.eq.s32.totalorder %v1675_v1, 3 }
 0x113   : > { %s986_s15 = sshll.u32 %s1647_s19, 3  ;;  %s994_s19 = sshll.u32 %s1364_s30, 7 }
 0x114   : > { %s514_s21 = scalar_lea.vmem [#allocation13], %s986_s15  ;;  %s1869_s20 = sld [smem:[#allocation28_spill]] }
 0x115   : > { %s738_s25 = sshll.u32 %s514_s21, 4  ;;  %s1382_s6 = smov [#allocation13]   ;;  %s739_s25 = int_to_ptr.vmem [resolvable:$true] %s738_s25 }
 0x116   : > { %s1278_s26 = scalar_lea.vmem %s739_s25, 128  ;;  %s1282_s17 = sshll.u32 %s1382_s6, 4  ;;  %s1283_s17 = int_to_ptr.vmem [resolvable:$false] %s1282_s17 }
 0x117   : > { %p1279_p0 = scmp.ne.s32.totalorder %s739_s25, %s1278_s26  ;;  %s1284_s30 = scalar_lea.vmem %s1283_s17, 256 }
 0x118   : > { %p1285_p12 = scmp.lt.s32.totalorder %s739_s25, %s1283_s17  ;;  %p1286_p10 = scmp.lt.s32.totalorder %s1284_s30, %s1278_s26 }
 0x119   : > { %p1280_p3 = pnand %p1279_p0, %p1867_p9 }
 0x11a   : > { %s1775_s12 = scalar_lea.hbm %s1869_s20, %s994_s19  ;;  %p1287_p4 = por %p1286_p10, %p1285_p12 }
 0x11b   : > { %p1281_p1 = pneg %p1280_p3 }
 0x11d   : > { %p1288_p7 = pnand %p1287_p4, %p1281_p1 }
 0x133   : > { %v652_v30 = vpop.xlane.xlu1 %651  ;;  %v553_v33 = vpop.xlane.xlu0 %552 }
 0x134   : > { %v653_v31 = vrot.slane %v652_v30, 4  ;;  %v554_v35 = vrot.slane %v553_v33, 4 }
 0x136   : > { %v654_v32 = vadd.f32 %v653_v31, %v652_v30  ;;  %v555_v37 = vadd.f32 %v554_v35, %v553_v33 }
 0x137   : > { %v664_v34 = vpop.xlane.xlu1 %663  ;;  %v564_v40 = vpop.xlane.xlu0 %563 }
 0x138   : > { %v665_v36 = vrot.slane %v664_v34, 4  ;;  %v655_v39 = vrot.slane %v654_v32, 2  ;;  %v556_v41 = vrot.slane %v555_v37, 2  ;;  %v565_v43 = vrot.slane %v564_v40, 4 }
 0x13a   : > { %v666_v38 = vadd.f32 %v665_v36, %v664_v34  ;;  %v566_v44 = vadd.f32 %v565_v43, %v564_v40  ;;  %v557_v45 = vadd.f32 %v556_v41, %v555_v37  ;;  %v656_v46 = vadd.f32 %v655_v39, %v654_v32 }
 0x13c   : > { %v667_v42 = vrot.slane %v666_v38, 2  ;;  %v567_v48 = vrot.slane %v566_v44, 2  ;;  %v558_v49 = vrot.slane %v557_v45, 1  ;;  %v657_v52 = vrot.slane %v656_v46, 1 }
 0x13e   : > { %v668_v47 = vadd.f32 %v667_v42, %v666_v38  ;;  %v568_v50 = vadd.f32 %v567_v48, %v566_v44  ;;  %v559_v51 = vadd.f32 %v558_v49, %v557_v45  ;;  %v658_v56 = vadd.f32 %v657_v52, %v656_v46 }
 0x140   : > { %997 = vpush %v559_v51  ;;  %v569_v53 = vrot.slane %v568_v50, 1  ;;  %v669_v54 = vrot.slane %v668_v47, 1 }
 0x142   : > { %v570_v55 = vadd.f32 %v569_v53, %v568_v50  ;;  %v670_v57 = vadd.f32 %v669_v54, %v668_v47 }
 0x144   : > { %999 = vpush %v570_v55 }
 0x145   : > { %1001 = vpush %v658_v56 }
 0x146   : > { %1003 = vpush %v670_v57 }
 0x171   : > { %s998_s1 = spop %997 }
 0x172   : > { %v672_v58 = vstv %s998_s1 }
 0x173   : > { %v673_v60 = vsel %vm633_vm4, %v672_v58, 0.0 }
 0x175   : > { %s1000_s29 = spop %999 }
 0x176   : > { %v675_v59 = vstv %s1000_s29  ;;  %s1002_s27 = spop %1001 }
 0x177   : > { %v676_v61 = vsel %vm674_vm5, %v675_v59, 0.0  ;;  %v679_v62 = vstv %s1002_s27  ;;  %s1004_s23 = spop %1003 }
 0x178   : > { %v677_v63 = vadd.f32 %v676_v61, %v673_v60  ;;  %v683_v0 = vstv %s1004_s23  ;;  %v680_v2 = vsel %vm678_vm6, %v679_v62, 0.0 }
 0x179   : > { %v684_v4 = vsel %vm682_vm7, %v683_v0, 0.0 }
 0x17a   : > { %v681_v3 = vadd.f32 %v680_v2, %v677_v63 }
 0x17c   : > { %v685_v5 = vadd.f32 %v684_v4, %v681_v3 }
 0x17e   : > { %686 = vst [vmem:[%s514_s21] sm:$0xff] %v685_v5 }
 0x17f   : > { %1291 = shalt.err (!%p1288_p7)
}
 0x180   : > { %s1292_s10 = scalar_lea.hbm %s1775_s12, 128  ;;  %s1296_s24 = scalar_lea.hbm %s1869_s20, 256 }
 0x181   : > { %p1293_p8 = scmp.ne.s32.totalorder %s1775_s12, %s1292_s10  ;;  %p1297_p11 = scmp.lt.u32.totalorder %s1775_s12, %s1869_s20 }
 0x182   : > { %p1298_p2 = scmp.lt.u32.totalorder %s1296_s24, %s1292_s10  ;;  %p1300_p0 = scmp.lt.u32.totalorder %s1292_s10, %s1775_s12 }
 0x183   : > { %p1294_p6 = pnand %p1293_p8, %p1867_p9 }
 0x184   : > { %p1299_p5 = por %p1298_p2, %p1297_p11 }
 0x185   : > { %p1295_p13 = pneg %p1294_p6 }
 0x186   : > { %p1301_p3 = por %p1300_p0, %p1299_p5 }
 0x188   : > { %p1302_p1 = pnand %p1301_p3, %p1295_p13 }
 0x18a   : > { %1305 = shalt.err (!%p1302_p1)
}
 0x18b   : > { %1015 = dma.vmem_to_hbm [thread:$0]  (%p1867_p9), %s739_s25, 128, %s1775_s12, %s1719_s9  }
 0x18c PF: > { %s1870_s15 = sld [smem:[#allocation19_spill]]  ;;  %s1871_s29 = sld [smem:[#allocation25_spill]] }
 0x18d   : > { %s1872_s27 = sld [smem:[#allocation22_spill]] }
 0x192   : > { %s750_s23 = sand.u32 1, %s1870_s15   ;;  %p1873_p12 = scmp.ne.s32.totalorder %s1871_s29, 0 }
 0x193   : > { %p1874_p10 = scmp.ge.s32.totalorder %s1872_s27, 2  ;;  %s751_s19 = scalar_lea.sflag [#allocation4], %s750_s23 }
 0x195   : > { %p1033_p4 = pnand %p1874_p10, %p1873_p12 }
 0x197   : > { %1343 = dma.done.wait (!%p1033_p4), %s751_s19, 16  }
 0x198   : > { %1345 = vsyncadd (!%p1033_p4), %s751_s19, 4294967280  ;;  %s1875_s21 = sadd.s32 4294967294, %s1872_s27  }
 0x199   : > { %s758_s14 = sand.u32 1, %s1875_s21  }
 0x19a   : > { %s759_s8 = scalar_lea.sflag [#allocation12], %s758_s14 }
 0x19b   : > { %1347 = dma.done.wait (!%p1033_p4), %s759_s8, 144  }
 0x19c   : > { %1349 = vsyncadd (!%p1033_p4), %s759_s8, 4294967152  ;;  %s34_s10 = sadd.s32 1, %s1872_s27   ;;  %s1876_s18 = sld [smem:[#allocation20_spill]] }
 0x19d   : > { %p31_p9 = scmp.ge.s32.totalorder %s34_s10, 4   ;;  %s1877_s29 = sld [smem:[#allocation24_spill]] }
 0x19e   : > { %s1878_s30 = sld [smem:[#allocation21_spill]]  ;;  %s1879_s9 = sld [smem:[#allocation23_spill]] }
 0x19f   : > { %s1880_s27 = smov %s1356_s28  ;;  %33 = sbr.rel (!%p31_p9) target bundleno = 16 (0x10), region = 164 }
 0x1a2   : > { %s1881_s28 = smov %s1876_s18 }
 0x1a6   :  { %772 = vsyncpa [#allocation3], 1 }
 0x1a7   :  { %774 = vsyncpa [#allocation3 + $0x1], 1 }
 0x1a8   :  { %775 = vsyncpa [#allocation6], 1 }
 0x1a9   :  { %777 = vsyncpa [#allocation6 + $0x1], 1 }
 0x1aa   :  { %778 = vsyncpa [#allocation9], 1 }
 0x1ab   :  { %780 = vsyncpa [#allocation9 + $0x1], 1 }
 0x1ac   :  { %781 = vsyncpa [#allocation4], 1 }
 0x1ad   :  { %783 = vsyncpa [#allocation4 + $0x1], 1 }
 0x1ae   :  { %784 = vsyncpa [#allocation12], 1 }
 0x1af   :  { %786 = vsyncpa [#allocation12 + $0x1], 1 }

</bundles_post_ra>
